<compile_context>
chip_gen: v6e
topology: v6e:2x2x1
jax: 0.10.0
libtpu: 0.0.40
codegen_flags: <defaults>
</compile_context>

<pallas_src>
import jax
import jax.numpy as jnp
from jax.experimental import pallas as pl
from jax.experimental.pallas import tpu as pltpu


def _meanact_kernel(x_ref, o_ref):
    # exp on the EUP (separate bundle slot), clamp on the VPU, fused store.
    x = x_ref[...].astype(jnp.float32)
    y = jnp.clip(jnp.exp(x), 1e-5, 1e6)
    o_ref[...] = y.astype(o_ref.dtype)


def _pick_block(dim, want, align):
    # Block dims must be a multiple of `align` or equal to the full extent.
    if dim <= want:
        return dim                      # full extent (always legal)
    return max(align, (want // align) * align)


@jax.jit
def meanact_forward(x):
    """clamp(exp(x), 1e-5, 1e6) — MeanAct.forward for any input rank."""
    orig_shape = x.shape
    x2 = x.reshape(1, -1) if x.ndim < 2 else x.reshape(-1, x.shape[-1])
    M, N = x2.shape

    # Lane-dense tiling: last-dim block is a multiple of 128 (unmasked vst),
    # sublane block a multiple of 8.  512x1024 f32 tiles (2 MiB) leave ample
    # headroom for double-buffering even under v7x's 64 MiB VMEM.
    bm = _pick_block(M, 512, 8)
    bn = _pick_block(N, 1024, 128)
    grid = (pl.cdiv(M, bm), pl.cdiv(N, bn))

    cost = pl.CostEstimate(
        flops=2 * M * N,                        # min + max per element
        transcendentals=M * N,                  # exp per element
        bytes_accessed=2 * M * N * x2.dtype.itemsize)

    out = pl.pallas_call(
        _meanact_kernel,
        out_shape=jax.ShapeDtypeStruct((M, N), x.dtype),
        grid=grid,
        in_specs=[pl.BlockSpec((bm, bn), lambda i, j: (i, j))],
        out_specs=pl.BlockSpec((bm, bn), lambda i, j: (i, j)),
        compiler_params=pltpu.CompilerParams(
            dimension_semantics=("parallel", "parallel")),
        cost_estimate=cost,
    )(x2)
    return out.reshape(orig_shape)


if __name__ == "__main__":
    key = jax.random.PRNGKey(0)
    k1, k2 = jax.random.split(key)

    # Small shapes consistent with MeanAct's use on decoder outputs:
    # one lane-dense (multiple-of-128) case and one tiny unaligned case.
    # Scale by 6 so both the 1e-5 lower clamp and the 1e6 upper clamp fire.
    x_a = 6.0 * jax.random.normal(k1, (16, 256), dtype=jnp.float32)
    x_b = 6.0 * jax.random.normal(k2, (3, 40), dtype=jnp.float32)

    for x in (x_a, x_b):
        out = jax.block_until_ready(meanact_forward(x))
        ref = jnp.clip(jnp.exp(x), 1e-5, 1e6)
        assert out.shape == x.shape
        assert out.dtype == x.dtype
        assert jnp.allclose(out, ref, atol=1e-5, rtol=1e-5)

    print("KERNEL_OK")
</pallas_src>

<mosaic_0001>
module attributes {stable_mosaic.version = 11 : i64} {
  func.func @_meanact_kernel(%arg0: i32, %arg1: i32, %arg2: memref<16x256xf32, #tpu.memory_space<vmem>>, %arg3: memref<16x256xf32, #tpu.memory_space<vmem>>) attributes {dimension_semantics = [#tpu.dimension_semantics<parallel>, #tpu.dimension_semantics<parallel>], iteration_bounds = array<i64: 1, 1>, scalar_prefetch = 0 : i64, scratch_operands = 0 : i64, tpu.core_type = #tpu.core_type<tc>, window_params = [{transform_indices = @transform_0, window_bounds = array<i64: 16, 256>}, {transform_indices = @transform_1, window_bounds = array<i64: 16, 256>}]} {
    %c0 = arith.constant 0 : index
    %c0_0 = arith.constant 0 : index
    %0 = vector.load %arg2[%c0, %c0_0] : memref<16x256xf32, #tpu.memory_space<vmem>>, vector<16x256xf32>
    %1 = math.exp %0 : vector<16x256xf32>
    %cst = arith.constant 9.99999974E-6 : f32
    %cst_1 = arith.constant 1.000000e+06 : f32
    %2 = vector.broadcast %cst : f32 to vector<16x256xf32>
    %3 = arith.maximumf %2, %1 : vector<16x256xf32>
    %4 = vector.broadcast %cst_1 : f32 to vector<16x256xf32>
    %5 = arith.minimumf %4, %3 : vector<16x256xf32>
    %c0_2 = arith.constant 0 : index
    %c0_3 = arith.constant 0 : index
    %6 = vector.load %arg3[%c0_2, %c0_3] : memref<16x256xf32, #tpu.memory_space<vmem>>, vector<16x256xf32>
    tpu.vector_store %arg3[%c0_2, %c0_3], %5 {strides = array<i32>} : memref<16x256xf32, #tpu.memory_space<vmem>>, vector<16x256xf32>,
    return
  }
  func.func @transform_0(%arg0: i32, %arg1: i32) -> (i32, i32) {
    %c0_i32 = arith.constant 0 : i32
    return %arg0, %arg1 : i32, i32
  }
  func.func @transform_1(%arg0: i32, %arg1: i32) -> (i32, i32) {
    %c0_i32 = arith.constant 0 : i32
    return %arg0, %arg1 : i32, i32
  }
}

</mosaic_0001>

<bundles_post_ra>
// kernel: meanact_forward.1
= control target key start
LH: loop header
LB: loop body
LE: loop exit
PB: predicated region body
PF: predicated region fallthrough
CT: control target
= control target key end

     0   :  { %6 = vsyncpa [#allocation3], 0  ;;  %s146_s0 = inlined_call_operand.hbm [shape: f32[16,256], index: 0, kind: input, shape index: {}]   ;;  %s147_s1 = inlined_call_operand.hbm [shape: f32[16,256], index: 1, kind: output, shape index: {}]  }
   0x1   :  { %7 = vsyncpa [#allocation4], 0  ;;  %s120_s6 = smov [#allocation2]  }
   0x2   :  { %s13_s7 = sshll.u32 %s120_s6, 4  ;;  %s14_s7 = int_to_ptr.vmem [resolvable:$true] %s13_s7 }
   0x3   :  { %s84_s8 = scalar_lea.vmem %s14_s7, 512  ;;  %p89_p1 = scmp.lt.s32.totalorder %s14_s7, %s14_s7 }
   0x4   :  { %p85_p0 = scmp.ne.s32.totalorder %s14_s7, %s84_s8  ;;  %p90_p2 = scmp.lt.s32.totalorder %s84_s8, %s84_s8 }
   0x6   :  { %p91_p3 = por %p90_p2, %p89_p1 }
   0x8   :  { %p92_p4 = pnand %p91_p3, %p85_p0 }
   0xa   :  { %95 = shalt.err (!%p92_p4)
}
   0xb   :  { %s121_s9 = smov 256   ;;  %s122_s10 = smov 16  }
   0xc   :  { %19 = dma.hbm_to_vmem [thread:$0]  %s146_s0, 512, %s14_s7, [#allocation3], %s121_s9, %s121_s9, %s122_s10  }
   0xd   :  { %116 = dma.done.wait [#allocation3], 512  }
   0xe   :  { %117 = vsyncadd [#allocation3], 4294966784  ;;  %v23_v0 = vld [vmem:[#allocation2] sm:$0xff]  ;;  %v24_v1 = vld [vmem:[#allocation2 + $0x8] sm:$0xff]  ;;  %s123_s0 = smov [#allocation5]  }
   0xf   :  { %v25_v2 = vld [vmem:[#allocation2 + $0x10] sm:$0xff]  ;;  %v27_v3 = vmul.f32 1.442695, %v23_v0  ;;  %v29_v4 = vmul.f32 1.442695, %v24_v1  ;;  %v26_v6 = vld [vmem:[#allocation2 + $0x18] sm:$0xff] }
  0x10   :  { %v31_v5 = vmul.f32 1.442695, %v25_v2  ;;  %v33_v7 = vmul.f32 1.442695, %v26_v6  ;;  %s52_s13 = sshll.u32 %s123_s0, 4  ;;  %s53_s13 = int_to_ptr.vmem [resolvable:$true] %s52_s13 }
  0x11   :  { %68 = vpow2.f32 %v27_v3  ;;  %s96_s14 = scalar_lea.vmem %s53_s13, 512  ;;  %p101_p6 = scmp.lt.s32.totalorder %s53_s13, %s53_s13 }
  0x12   :  { %70 = vpow2.f32 %v29_v4  ;;  %p97_p5 = scmp.ne.s32.totalorder %s53_s13, %s96_s14  ;;  %p102_p7 = scmp.lt.s32.totalorder %s96_s14, %s96_s14 }
  0x13   :  { %72 = vpow2.f32 %v31_v5 }
  0x14   :  { %74 = vpow2.f32 %v33_v7  ;;  %p103_p8 = por %p102_p7, %p101_p6 }
  0x16   :  { %p104_p9 = pnand %p103_p8, %p97_p5 }
  0x1e   :  { %v69_v8 = vpop.eup %68 }
  0x1f   :  { %v71_v9 = vpop.eup %70  ;;  %v35_v10 = vmax.f32 %v69_v8, 1e-05 }
  0x20   :  { %v73_v11 = vpop.eup %72  ;;  %v36_v12 = vmax.f32 %v71_v9, 1e-05 }
  0x21   :  { %v75_v13 = vpop.eup %74  ;;  %v39_v14 = vmin.f32 %v35_v10, 1000000.0  ;;  %v37_v15 = vmax.f32 %v73_v11, 1e-05 }
  0x22   :  { %v40_v16 = vmin.f32 %v36_v12, 1000000.0  ;;  %v38_v17 = vmax.f32 %v75_v13, 1e-05 }
  0x23   :  { %43 = vst [vmem:[#allocation5] sm:$0xff] %v39_v14  ;;  %v41_v18 = vmin.f32 %v37_v15, 1000000.0 }
  0x24   :  { %44 = vst [vmem:[#allocation5 + $0x8] sm:$0xff] %v40_v16  ;;  %v42_v19 = vmin.f32 %v38_v17, 1000000.0 }
  0x25   :  { %45 = vst [vmem:[#allocation5 + $0x10] sm:$0xff] %v41_v18 }
  0x26   :  { %46 = vst [vmem:[#allocation5 + $0x18] sm:$0xff] %v42_v19 }
  0x27   :  { %107 = shalt.err (!%p104_p9)
}
  0x28   :  { %58 = dma.vmem_to_hbm [thread:$0]  %s53_s13, 512, %s147_s1, [#allocation4], %s121_s9, %s121_s9, %s122_s10  }
  0x29   :  { %118 = dma.done.wait [#allocation4], 512  }
  0x2a   :  { %119 = vsyncadd [#allocation4], 4294966784 }
  0x2b   :  { %62 = vsyncpa [#allocation3], 1 }
  0x2c   :  { %63 = vsyncpa [#allocation4], 1 }

</bundles_post_ra>
